<compile_context>
chip_gen: v5e
topology: v5e:2x2
jax: 0.10.0
libtpu: 0.0.40
codegen_flags: <defaults>
</compile_context>

<pallas_src>
import functools
import math

import numpy as np

import jax
import jax.numpy as jnp
from jax.experimental import pallas as pl
from jax.experimental.pallas import tpu as pltpu


# ---------------------------------------------------------------------------
# Kernels
# ---------------------------------------------------------------------------
def _layernorm_kernel(x_ref, gamma_ref, beta_ref, o_ref, *, inv_n, inv_nm1, eps):
    """Plain path: one logical row per tile row (features is the lane axis)."""
    # mean from a transient f32 upcast (do NOT keep x_f32 live across `centered`
    # -> one fewer full-tile f32 temporary at peak).
    mean = jnp.sum(x_ref[...].astype(jnp.float32), axis=-1, keepdims=True) * inv_n
    centered = x_ref[...].astype(jnp.float32) - mean                     # (TR, F)
    # Unbiased variance (Bessel's correction), matching torch.Tensor.std().
    var = jnp.sum(centered * centered, axis=-1, keepdims=True) * inv_nm1
    denom = jnp.sqrt(var) + eps                                          # (TR, 1)
    # EUP approximate reciprocal + one Newton step (restores ~f32 accuracy)
    # instead of a broadcast VPU divide over the whole (TR, F) tile.
    inv = pl.reciprocal(denom, approx=True)
    inv = inv * (2.0 - denom * inv)
    gamma = gamma_ref[...].astype(jnp.float32)                           # (1, F)
    beta = beta_ref[...].astype(jnp.float32)                             # (1, F)
    o_ref[...] = (centered * (gamma * inv) + beta).astype(o_ref.dtype)


def _layernorm_folded_kernel(x_ref, gamma_ref, beta_ref, seg_ref, segt_ref, o_ref,
                             *, inv_n, inv_nm1, eps):
    """Lane-folded path: k original rows packed into the 128-wide lane axis.

    x_ref is (TR, k*F); lanes [s*F, (s+1)*F) of tile row r hold original row
    r*k + s. Per-segment reductions/broadcasts use tiny 0/1 matmuls on the MXU
    (idle in this mem-bound kernel); HIGHEST precision keeps f32 accuracy.
    """
    hi = jax.lax.Precision.HIGHEST
    seg = seg_ref[...]        # (k*F, k) one-hot segment-collect matrix, f32
    seg_t = segt_ref[...]     # (k, k*F) segment-broadcast matrix, f32
    # Per-segment mean (transient f32 upcast; not kept live across `centered`).
    mean_seg = jnp.dot(x_ref[...].astype(jnp.float32), seg,
                       precision=hi, preferred_element_type=jnp.float32) * inv_n
    centered = x_ref[...].astype(jnp.float32) - jnp.dot(
        mean_seg, seg_t, precision=hi, preferred_element_type=jnp.float32)
    var = jnp.dot(centered * centered, seg,
                  precision=hi, preferred_element_type=jnp.float32) * inv_nm1
    denom = jnp.sqrt(var) + eps                                          # (TR, k)
    inv = pl.reciprocal(denom, approx=True)
    inv = inv * (2.0 - denom * inv)
    inv_b = jnp.dot(inv, seg_t, precision=hi,
                    preferred_element_type=jnp.float32)                  # (TR, k*F)
    gamma = gamma_ref[...].astype(jnp.float32)                           # (1, k*F)
    beta = beta_ref[...].astype(jnp.float32)                             # (1, k*F)
    o_ref[...] = (centered * (gamma * inv_b) + beta).astype(o_ref.dtype)


# ---------------------------------------------------------------------------
# Tiling / VMEM budgeting
# ---------------------------------------------------------------------------
def _round_up(x, m):
    return ((x + m - 1) // m) * m


def _vmem_capacity_bytes():
    try:
        return int(pltpu.get_tpu_info().vmem_capacity_bytes)
    except Exception:
        return 64 * 1024 * 1024  # conservative (v7x-sized) fallback


def _pick_row_tile(rows, features, in_itemsize, out_itemsize, vmem_cap, sublane):
    # Working set per tile row:
    #   2 double-buffered input blocks + 2 output blocks (at I/O dtype width)
    #   + ~3 live f32 (row_tile, features) temporaries inside the body.
    per_row_bytes = (2 * (in_itemsize + out_itemsize) + 3 * 4) * features
    # Leave headroom for Mosaic internal scratch / params / semaphores.
    budget = min(int(vmem_cap * 0.6), 80 * 1024 * 1024)
    tile = budget // max(per_row_bytes, 1)
    # Smaller hard cap on 64 MiB-VMEM parts (v7x); 512 already ~85% of roofline.
    max_tile = 512 if vmem_cap <= (64 << 20) else 1024
    tile = max(sublane, min(max_tile, (tile // sublane) * sublane))
    # Keep >= ~4 grid steps so double-buffering overlaps and ("parallel",)
    # sharding has work for both v7x TensorCores.
    tile = min(tile, _round_up(max(pl.cdiv(rows, 4), 1), sublane))
    if rows <= tile:
        return max(rows, 1)  # single full-extent block (full-dim blocks are always legal)
    return tile


# ---------------------------------------------------------------------------
# Wrapper
# ---------------------------------------------------------------------------
def layernorm_pallas(x, a_2, b_2, eps=1e-6, row_tile=None, buffers=2):
    """x: (..., features); a_2, b_2: (features,). Returns same shape/dtype as x."""
    orig_shape = x.shape
    features = int(orig_shape[-1])
    rows = int(math.prod(orig_shape[:-1])) if len(orig_shape) > 1 else 1

    in_itemsize = np.dtype(x.dtype).itemsize
    out_itemsize = in_itemsize
    # Align tiles to the dtype's sublane packing (8 rows f32, 16 bf16, 32 int8).
    sublane = {4: 8, 2: 16, 1: 32}.get(in_itemsize, 8)
    vmem_cap = _vmem_capacity_bytes()

    x2 = x.reshape(rows, features)
    gamma = a_2.reshape(1, features)
    beta = b_2.reshape(1, features)

    inv_n = 1.0 / features
    inv_nm1 = 1.0 / max(features - 1, 1)  # guard features == 1

    # Lane folding: for features < 128 pack k = 128 // features rows into the
    # lane axis so the output block's last dim is a multiple of 128
    # (unmasked vst, full HBM write bandwidth on v5e; denser DMA everywhere).
    fold = 1
    if features < 128 and 128 % features == 0:
        k = 128 // features
        if k > 1 and rows % k == 0:
            fold = k

    if fold > 1:
        kf = fold * features
        rows_eff = rows // fold
        feat_eff = kf
        x_in = x2.reshape(rows_eff, kf)          # row-major fold (free reshape)
        gamma_in = jnp.tile(gamma, (1, fold))    # lane j -> gamma[j % features]
        beta_in = jnp.tile(beta, (1, fold))
        seg_np = (np.arange(kf)[:, None] // features == np.arange(fold)[None, :])
        seg = jnp.asarray(seg_np.astype(np.float32))       # (kf, fold)
        seg_t = jnp.asarray(seg_np.T.astype(np.float32))   # (fold, kf)
    else:
        rows_eff, feat_eff = rows, features
        x_in, gamma_in, beta_in = x2, gamma, beta
        seg = seg_t = None

    if row_tile is None:
        row_tile = _pick_row_tile(rows_eff, feat_eff, in_itemsize, out_itemsize,
                                  vmem_cap, sublane)

    grid = (pl.cdiv(rows_eff, row_tile),)

    # VMEM accounting: pipelined I/O buffers (at I/O dtype width) + ~3 live f32
    # full-tile temporaries in the body + params, with >= 10 MiB headroom for
    # Mosaic's internal scratch (important on v7x: 64 MiB physical VMEM).
    n_bufs = max(2, int(buffers))
    pipeline_bytes = n_bufs * row_tile * feat_eff * (in_itemsize + out_itemsize)
    temps_bytes = 3 * row_tile * feat_eff * 4
    params_bytes = 4 * n_bufs * feat_eff * in_itemsize + 4 * feat_eff * 8
    footprint = pipeline_bytes + temps_bytes + params_bytes + (6 << 20)
    vmem_limit = int(min(max(footprint, 32 << 20), vmem_cap - (10 << 20)))
    vmem_limit = max(vmem_limit, 16 << 20)

    x_idx = lambda i: (i, 0)
    if n_bufs > 2:
        # Extra pipelining depth only when explicitly requested (sweep on
        # v5e/v6e; the 64 MiB budget on v7x usually does not clear it).
        x_spec = pl.BlockSpec((row_tile, feat_eff), x_idx,
                              pipeline_mode=pl.Buffered(n_bufs))
    else:
        x_spec = pl.BlockSpec((row_tile, feat_eff), x_idx)
    param_spec = pl.BlockSpec((1, feat_eff), lambda i: (0, 0))
    out_spec = pl.BlockSpec((row_tile, feat_eff), x_idx)

    compiler_params = pltpu.CompilerParams(
        dimension_semantics=("parallel",),   # shards the row grid across TCs on v7x
        vmem_limit_bytes=vmem_limit,
    )

    if fold > 1:
        kernel = functools.partial(_layernorm_folded_kernel,
                                   inv_n=inv_n, inv_nm1=inv_nm1, eps=float(eps))
        out = pl.pallas_call(
            kernel,
            out_shape=jax.ShapeDtypeStruct((rows_eff, feat_eff), x.dtype),
            grid_spec=pltpu.PrefetchScalarGridSpec(
                num_scalar_prefetch=0,
                grid=grid,
                in_specs=[
                    x_spec,
                    param_spec,
                    param_spec,
                    pl.BlockSpec((feat_eff, fold), lambda i: (0, 0)),
                    pl.BlockSpec((fold, feat_eff), lambda i: (0, 0)),
                ],
                out_specs=out_spec,
            ),
            compiler_params=compiler_params,
        )(x_in, gamma_in, beta_in, seg, seg_t)
    else:
        kernel = functools.partial(_layernorm_kernel,
                                   inv_n=inv_n, inv_nm1=inv_nm1, eps=float(eps))
        out = pl.pallas_call(
            kernel,
            out_shape=jax.ShapeDtypeStruct((rows_eff, feat_eff), x.dtype),
            grid_spec=pltpu.PrefetchScalarGridSpec(
                num_scalar_prefetch=0,
                grid=grid,
                in_specs=[x_spec, param_spec, param_spec],
                out_specs=out_spec,
            ),
            compiler_params=compiler_params,
        )(x_in, gamma_in, beta_in)

    return out.reshape(orig_shape)


# ---------------------------------------------------------------------------
# Pure-JAX reference (same semantics as the PyTorch module)
# ---------------------------------------------------------------------------
def layernorm_ref(x, a_2, b_2, eps=1e-6):
    xf = x.astype(jnp.float32)
    mean = jnp.mean(xf, axis=-1, keepdims=True)
    centered = xf - mean
    n = x.shape[-1]
    var = jnp.sum(centered * centered, axis=-1, keepdims=True) / max(n - 1, 1)
    std = jnp.sqrt(var)
    return (a_2 * centered / (std + eps) + b_2).astype(x.dtype)


if __name__ == "__main__":
    key = jax.random.PRNGKey(0)
    kx, kg, kb, kx2, kx3 = jax.random.split(key, 5)

    # 1) features < 128 -> lane-folded path (k = 128 // 32 = 4), unit params.
    batch, seq, hidden = 2, 8, 32
    x = jax.random.normal(kx, (batch, seq, hidden), dtype=jnp.float32)
    a_2 = jnp.ones((hidden,), dtype=jnp.float32)
    b_2 = jnp.zeros((hidden,), dtype=jnp.float32)
    out = jax.block_until_ready(layernorm_pallas(x, a_2, b_2))
    ref = layernorm_ref(x, a_2, b_2)
    assert out.shape == x.shape
    # (1e-3 tolerance on the folded path: segment sums go through MXU matmuls.)
    assert jnp.allclose(out, ref, atol=1e-3, rtol=1e-3), "mismatch (folded, unit params)"

    # 2) folded path with non-trivial gamma/beta.
    a_2r = 1.0 + 0.1 * jax.random.normal(kg, (hidden,), dtype=jnp.float32)
    b_2r = 0.1 * jax.random.normal(kb, (hidden,), dtype=jnp.float32)
    out2 = jax.block_until_ready(layernorm_pallas(x, a_2r, b_2r))
    ref2 = layernorm_ref(x, a_2r, b_2r)
    assert jnp.allclose(out2, ref2, atol=1e-3, rtol=1e-3), "mismatch (folded, random params)"

    # 3) features >= 128 with a ragged row count -> plain path + ragged last block.
    hidden3 = 256
    x3 = jax.random.normal(kx2, (3, 5, hidden3), dtype=jnp.float32)
    a3 = 1.0 + 0.1 * jax.random.normal(kg, (hidden3,), dtype=jnp.float32)
    b3 = 0.1 * jax.random.normal(kb, (hidden3,), dtype=jnp.float32)
    out3 = jax.block_until_ready(layernorm_pallas(x3, a3, b3))
    ref3 = layernorm_ref(x3, a3, b3)
    assert jnp.allclose(out3, ref3, atol=1e-4, rtol=1e-4), "mismatch (plain, ragged)"

    # 4) bf16 I/O through the folded path (16-row sublane alignment).
    x4 = jax.random.normal(kx3, (2, 32, hidden), dtype=jnp.float32).astype(jnp.bfloat16)
    a4 = a_2r.astype(jnp.bfloat16)
    b4 = b_2r.astype(jnp.bfloat16)
    out4 = jax.block_until_ready(layernorm_pallas(x4, a4, b4))
    ref4 = layernorm_ref(x4, a4, b4)
    assert jnp.allclose(out4.astype(jnp.float32), ref4.astype(jnp.float32),
                        atol=3e-2, rtol=3e-2), "mismatch (bf16 folded)"

    print("KERNEL_OK")
</pallas_src>

<mosaic_0001>
module attributes {stable_mosaic.version = 11 : i64} {
  func.func @_layernorm_folded_kernel(%arg0: i32, %arg1: memref<4x128xf32, #tpu.memory_space<vmem>>, %arg2: memref<1x128xf32, #tpu.memory_space<vmem>>, %arg3: memref<1x128xf32, #tpu.memory_space<vmem>>, %arg4: memref<128x4xf32, #tpu.memory_space<vmem>>, %arg5: memref<4x128xf32, #tpu.memory_space<vmem>>, %arg6: memref<4x128xf32, #tpu.memory_space<vmem>>) attributes {dimension_semantics = [#tpu.dimension_semantics<parallel>], iteration_bounds = array<i64: 1>, scalar_prefetch = 0 : i64, scratch_operands = 0 : i64, tpu.core_type = #tpu.core_type<tc>, window_params = [{transform_indices = @transform_0, window_bounds = array<i64: 4, 128>}, {pipeline_mode = #tpu.pipeline_mode<synchronous>, transform_indices = @transform_1, window_bounds = array<i64: 1, 128>}, {pipeline_mode = #tpu.pipeline_mode<synchronous>, transform_indices = @transform_2, window_bounds = array<i64: 1, 128>}, {pipeline_mode = #tpu.pipeline_mode<synchronous>, transform_indices = @transform_3, window_bounds = array<i64: 128, 4>}, {pipeline_mode = #tpu.pipeline_mode<synchronous>, transform_indices = @transform_4, window_bounds = array<i64: 4, 128>}, {transform_indices = @transform_5, window_bounds = array<i64: 4, 128>}]} {
    %c0 = arith.constant 0 : index
    %c0_0 = arith.constant 0 : index
    %0 = vector.load %arg4[%c0, %c0_0] : memref<128x4xf32, #tpu.memory_space<vmem>>, vector<128x4xf32>
    %c0_1 = arith.constant 0 : index
    %c0_2 = arith.constant 0 : index
    %1 = vector.load %arg5[%c0_1, %c0_2] : memref<4x128xf32, #tpu.memory_space<vmem>>, vector<4x128xf32>
    %c0_3 = arith.constant 0 : index
    %c0_4 = arith.constant 0 : index
    %2 = vector.load %arg1[%c0_3, %c0_4] : memref<4x128xf32, #tpu.memory_space<vmem>>, vector<4x128xf32>
    %cst = arith.constant dense<0.000000e+00> : vector<4x4xf32>
    %3 = tpu.matmul %2, %0, %cst {dimension_numbers = #tpu.dot_dimension_numbers<[1], [0], [0], [1], [0, 0, 1, 1], [], []>, precision = #tpu.contract_precision<fp32>} : vector<4x128xf32>, vector<128x4xf32>, vector<4x4xf32> -> vector<4x4xf32>
    %cst_5 = arith.constant 3.125000e-02 : f32
    %4 = vector.broadcast %cst_5 : f32 to vector<4x4xf32>
    %5 = arith.mulf %3, %4 : vector<4x4xf32>
    %c0_6 = arith.constant 0 : index
    %c0_7 = arith.constant 0 : index
    %6 = vector.load %arg1[%c0_6, %c0_7] : memref<4x128xf32, #tpu.memory_space<vmem>>, vector<4x128xf32>
    %cst_8 = arith.constant dense<0.000000e+00> : vector<4x128xf32>
    %7 = tpu.matmul %5, %1, %cst_8 {dimension_numbers = #tpu.dot_dimension_numbers<[1], [0], [0], [1], [0, 0, 1, 1], [], []>, precision = #tpu.contract_precision<fp32>} : vector<4x4xf32>, vector<4x128xf32>, vector<4x128xf32> -> vector<4x128xf32>
    %8 = arith.subf %6, %7 : vector<4x128xf32>
    %9 = arith.mulf %8, %8 : vector<4x128xf32>
    %cst_9 = arith.constant dense<0.000000e+00> : vector<4x4xf32>
    %10 = tpu.matmul %9, %0, %cst_9 {dimension_numbers = #tpu.dot_dimension_numbers<[1], [0], [0], [1], [0, 0, 1, 1], [], []>, precision = #tpu.contract_precision<fp32>} : vector<4x128xf32>, vector<128x4xf32>, vector<4x4xf32> -> vector<4x4xf32>
    %cst_10 = arith.constant 0.0322580636 : f32
    %11 = vector.broadcast %cst_10 : f32 to vector<4x4xf32>
    %12 = arith.mulf %10, %11 : vector<4x4xf32>
    %13 = math.sqrt %12 : vector<4x4xf32>
    %cst_11 = arith.constant 9.99999997E-7 : f32
    %14 = vector.broadcast %cst_11 : f32 to vector<4x4xf32>
    %15 = arith.addf %13, %14 : vector<4x4xf32>
    %16 = tpu.reciprocal %15 {approx = true} : vector<4x4xf32> -> vector<4x4xf32>
    %17 = arith.mulf %15, %16 : vector<4x4xf32>
    %cst_12 = arith.constant 2.000000e+00 : f32
    %18 = vector.broadcast %cst_12 : f32 to vector<4x4xf32>
    %19 = arith.subf %18, %17 : vector<4x4xf32>
    %20 = arith.mulf %16, %19 : vector<4x4xf32>
    %cst_13 = arith.constant dense<0.000000e+00> : vector<4x128xf32>
    %21 = tpu.matmul %20, %1, %cst_13 {dimension_numbers = #tpu.dot_dimension_numbers<[1], [0], [0], [1], [0, 0, 1, 1], [], []>, precision = #tpu.contract_precision<fp32>} : vector<4x4xf32>, vector<4x128xf32>, vector<4x128xf32> -> vector<4x128xf32>
    %c0_14 = arith.constant 0 : index
    %c0_15 = arith.constant 0 : index
    %22 = vector.load %arg2[%c0_14, %c0_15] : memref<1x128xf32, #tpu.memory_space<vmem>>, vector<1x128xf32>
    %c0_16 = arith.constant 0 : index
    %c0_17 = arith.constant 0 : index
    %23 = vector.load %arg3[%c0_16, %c0_17] : memref<1x128xf32, #tpu.memory_space<vmem>>, vector<1x128xf32>
    %24 = vector.broadcast %22 : vector<1x128xf32> to vector<4x128xf32>
    %25 = arith.mulf %24, %21 : vector<4x128xf32>
    %26 = arith.mulf %8, %25 : vector<4x128xf32>
    %27 = vector.broadcast %23 : vector<1x128xf32> to vector<4x128xf32>
    %28 = arith.addf %26, %27 : vector<4x128xf32>
    %c0_18 = arith.constant 0 : index
    %c0_19 = arith.constant 0 : index
    %29 = vector.load %arg6[%c0_18, %c0_19] : memref<4x128xf32, #tpu.memory_space<vmem>>, vector<4x128xf32>
    tpu.vector_store %arg6[%c0_18, %c0_19], %28 {strides = array<i32>} : memref<4x128xf32, #tpu.memory_space<vmem>>, vector<4x128xf32>,
    return
  }
  func.func @transform_0(%arg0: i32) -> (i32, i32) {
    %c0_i32 = arith.constant 0 : i32
    %c0_i32_0 = arith.constant 0 : i32
    return %arg0, %c0_i32 : i32, i32
  }
  func.func @transform_1(%arg0: i32) -> (i32, i32) {
    %c0_i32 = arith.constant 0 : i32
    %c0_i32_0 = arith.constant 0 : i32
    %c0_i32_1 = arith.constant 0 : i32
    return %c0_i32, %c0_i32_0 : i32, i32
  }
  func.func @transform_2(%arg0: i32) -> (i32, i32) {
    %c0_i32 = arith.constant 0 : i32
    %c0_i32_0 = arith.constant 0 : i32
    %c0_i32_1 = arith.constant 0 : i32
    return %c0_i32, %c0_i32_0 : i32, i32
  }
  func.func @transform_3(%arg0: i32) -> (i32, i32) {
    %c0_i32 = arith.constant 0 : i32
    %c0_i32_0 = arith.constant 0 : i32
    %c0_i32_1 = arith.constant 0 : i32
    return %c0_i32, %c0_i32_0 : i32, i32
  }
  func.func @transform_4(%arg0: i32) -> (i32, i32) {
    %c0_i32 = arith.constant 0 : i32
    %c0_i32_0 = arith.constant 0 : i32
    %c0_i32_1 = arith.constant 0 : i32
    return %c0_i32, %c0_i32_0 : i32, i32
  }
  func.func @transform_5(%arg0: i32) -> (i32, i32) {
    %c0_i32 = arith.constant 0 : i32
    %c0_i32_0 = arith.constant 0 : i32
    return %arg0, %c0_i32 : i32, i32
  }
}

</mosaic_0001>

<bundles_post_ra>
// kernel: tpu_custom_call.1
= control target key start
LH: loop header
LB: loop body
LE: loop exit
PB: predicated region body
PF: predicated region fallthrough
CT: control target
= control target key end

     0   :  { %s1622_s0 = inlined_call_operand.vmem [shape: f32[4,128], index: 0, kind: input, shape index: {}]   ;;  %s1623_s1 = inlined_call_operand.vmem [shape: f32[1,128], index: 1, kind: input, shape index: {}]   ;;  %s1624_s2 = inlined_call_operand.vmem [shape: f32[1,128], index: 2, kind: input, shape index: {}]   ;;  %s1625_s3 = inlined_call_operand.vmem [shape: f32[128,4], index: 3, kind: input, shape index: {}]   ;;  %s1626_s4 = inlined_call_operand.vmem [shape: f32[4,128], index: 4, kind: input, shape index: {}]   ;;  %s1627_s5 = inlined_call_operand.hbm [shape: f32[4,128], index: 5, kind: output, shape index: {}]  }
   0x1   :  { %v36_v0 = vld [vmem:[%s1625_s3 + $0x78] sm:$0xff]  ;;  %v35_v1 = vld [vmem:[%s1625_s3 + $0x70] sm:$0xff]  ;;  %v34_v2 = vld [vmem:[%s1625_s3 + $0x68] sm:$0xff] }
   0x2   :  { %v1146_v3 = vand.u32 4294901760, %v36_v0  ;;  %v1148_v4 = vand.u32 4294901760, %v35_v1  ;;  %v1150_v5 = vand.u32 4294901760, %v34_v2  ;;  %v33_v6 = vld [vmem:[%s1625_s3 + $0x60] sm:$0xff]  ;;  %v32_v7 = vld [vmem:[%s1625_s3 + $0x58] sm:$0xff]  ;;  %v31_v8 = vld [vmem:[%s1625_s3 + $0x50] sm:$0xff] }
   0x3   :  { %v1161_v9 = vand.u32 4294901760, %v33_v6  ;;  %v1163_v10 = vand.u32 4294901760, %v32_v7  ;;  %v1165_v11 = vand.u32 4294901760, %v31_v8  ;;  %v30_v12 = vld [vmem:[%s1625_s3 + $0x48] sm:$0xff]  ;;  %v29_v13 = vld [vmem:[%s1625_s3 + $0x40] sm:$0xff]  ;;  %v28_v18 = vld [vmem:[%s1625_s3 + $0x38] sm:$0xff] }
   0x4   :  { %40 = vmatpush.msra.mxu0 %v1146_v3  ;;  %v1175_v14 = vsub.f32 %v36_v0, %v1146_v3  ;;  %v1178_v15 = vsub.f32 %v35_v1, %v1148_v4  ;;  %v1181_v16 = vsub.f32 %v34_v2, %v1150_v5  ;;  %v1183_v17 = vand.u32 4294901760, %v30_v12  ;;  %236 = vmatpush.msra.mxu3 %v1146_v3  ;;  %v27_v26 = vld [vmem:[%s1625_s3 + $0x30] sm:$0xff] }
   0x5   :  { %v1190_v19 = vsub.f32 %v33_v6, %v1161_v9  ;;  %v1193_v20 = vsub.f32 %v32_v7, %v1163_v10  ;;  %v1196_v21 = vsub.f32 %v31_v8, %v1165_v11  ;;  %v1208_v25 = vand.u32 4294901760, %v29_v13 }
   0x6   :  { %42 = vmatpush.msra.mxu0 %v1148_v4  ;;  %v1200_v22 = vand.u32 4294901760, %v1175_v14  ;;  %v1203_v23 = vand.u32 4294901760, %v1178_v15  ;;  %v1206_v24 = vand.u32 4294901760, %v1181_v16  ;;  %183 = vmatpush.msra.mxu2 %v1175_v14  ;;  %v1217_v28 = vand.u32 4294901760, %v28_v18 }
   0x7   :  { %v1215_v27 = vand.u32 4294901760, %v1190_v19  ;;  %v1220_v29 = vsub.f32 %v30_v12, %v1183_v17  ;;  %238 = vmatpush.msra.mxu3 %v1148_v4  ;;  %v1231_v33 = vand.u32 4294901760, %v1193_v20 }
   0x8   :  { %44 = vmatpush.msra.mxu0 %v1150_v5  ;;  %v83_v30 = vsub.f32 %v1175_v14, %v1200_v22  ;;  %v89_v31 = vsub.f32 %v1178_v15, %v1203_v23  ;;  %v95_v32 = vsub.f32 %v1181_v16, %v1206_v24  ;;  %186 = vmatpush.msra.mxu2 %v1178_v15 }
   0x9   :  { %10 = vsyncpa [#allocation3], 0  ;;  %v1235_v34 = vand.u32 4294901760, %v1196_v21  ;;  %v1237_v35 = vand.u32 4294901760, %v27_v26  ;;  %v26_v36 = vld [vmem:[%s1625_s3 + $0x28] sm:$0xff]  ;;  %240 = vmatpush.msra.mxu3 %v1150_v5  ;;  %v101_v39 = vsub.f32 %v1190_v19, %v1215_v27  ;;  %v1251_v40 = vsub.f32 %v29_v13, %v1208_v25  ;;  %v25_v42 = vld [vmem:[%s1625_s3 + $0x20] sm:$0xff] }
   0xa   :  { %v1243_v37 = vand.u32 4294901760, %v83_v30  ;;  %46 = vmatpush.msra.mxu0 %v1161_v9  ;;  %v1246_v38 = vand.u32 4294901760, %v89_v31  ;;  %189 = vmatpush.msra.mxu2 %v1181_v16  ;;  %v1255_v41 = vand.u32 4294901760, %v1220_v29  ;;  %v1263_v43 = vand.u32 4294901760, %v95_v32  ;;  %v24_v47 = vld [vmem:[%s1625_s3 + $0x18] sm:$0xff]  ;;  %v23_v55 = vld [vmem:[%s1625_s3 + $0x10] sm:$0xff] }
   0xb   :  { %242 = vmatpush.msra.mxu3 %v1161_v9  ;;  %v107_v44 = vsub.f32 %v1193_v20, %v1231_v33  ;;  %v1267_v45 = vand.u32 4294901760, %v26_v36  ;;  %v1270_v46 = vsub.f32 %v28_v18, %v1217_v28  ;;  %v113_v48 = vsub.f32 %v1196_v21, %v1235_v34  ;;  %v22_v60 = vld [vmem:[%s1625_s3 + $0x8] sm:$0xff]  ;;  %v21_v1 = vld [vmem:[%s1625_s3] sm:$0xff]  ;;  %s1106_s30 = smov [#allocation2]   ;;  %s1064_s9 = sshll.u32 %s1627_s5, 4  ;;  %s1065_s9 = int_to_ptr.hbm [resolvable:$true] %s1064_s9 }
   0xc   :  { %85 = vmatpush.msra.mxu1 %v1243_v37  ;;  %48 = vmatpush.msra.mxu0 %v1163_v10  ;;  %v1281_v49 = vand.u32 4294901760, %v101_v39  ;;  %v1284_v50 = vand.u32 4294901760, %v1251_v40  ;;  %v1286_v51 = vand.u32 4294901760, %v25_v42  ;;  %v1289_v52 = vsub.f32 %v27_v26, %v1237_v35  ;;  %v1342_v7 = vld [vmem:[%s1622_s0] sm:$0xf]  ;;  %s1062_s6 = sshll.u32 %s1106_s30, 4  ;;  %s1063_s6 = int_to_ptr.vmem [resolvable:$true] %s1062_s6 }
   0xd   :  { %192 = vmatpush.msra.mxu2 %v1190_v19  ;;  %244 = vmatpush.msra.mxu3 %v1163_v10  ;;  %v119_v53 = vsub.f32 %v1220_v29, %v1255_v41  ;;  %v1293_v54 = vand.u32 4294901760, %v24_v47  ;;  %v1302_v56 = vand.u32 4294901760, %v107_v44  ;;  %v1305_v57 = vand.u32 4294901760, %v1270_v46  ;;  %1639 = vst [vmem:[#allocation8_spill] sm:$0xff] %v1342_v7 }
   0xe   :  { %91 = vmatpush.msra.mxu1 %v1246_v38  ;;  %50 = vmatpush.msra.mxu0 %v1165_v11  ;;  %v1308_v58 = vsub.f32 %v26_v36, %v1267_v45  ;;  %v1310_v59 = vand.u32 4294901760, %v113_v48  ;;  %v125_v61 = vsub.f32 %v1251_v40, %v1284_v50  ;;  %v1322_v62 = vand.u32 4294901760, %v1289_v52 }
   0xf   :  { %195 = vmatpush.msra.mxu2 %v1193_v20  ;;  %246 = vmatpush.msra.mxu3 %v1165_v11  ;;  %1636 = vst [vmem:[#allocation5_spill] sm:$0xff] %v1302_v56  ;;  %v1324_v63 = vand.u32 4294901760, %v23_v55  ;;  %v1327_v0 = vsub.f32 %v25_v42, %v1286_v51  ;;  %v1332_v2 = vand.u32 4294901760, %v119_v53  ;;  %v1335_v6 = vsub.f32 %v24_v47, %v1293_v54 }
  0x10   :  { %97 = vmatpush.msra.mxu1 %v1263_v43  ;;  %52 = vmatpush.msra.mxu0 %v1183_v17  ;;  %1637 = vst [vmem:[#allocation6_spill] sm:$0xff] %v1310_v59  ;;  %v131_v8 = vsub.f32 %v1270_v46, %v1305_v57  ;;  %v1349_v12 = vand.u32 4294901760, %v1308_v58  ;;  %v1351_v13 = vand.u32 4294901760, %v22_v60  ;;  %v1354_v18 = vand.u32 4294901760, %v1342_v7 }
  0x11   :  { %198 = vmatpush.msra.mxu2 %v1196_v21  ;;  %248 = vmatpush.msra.mxu3 %v1183_v17  ;;  %1638 = vst [vmem:[#allocation7_spill] sm:$0xff] %v1332_v2  ;;  %v1356_v26 = vand.u32 4294901760, %v21_v1  ;;  %v1362_v30 = vand.u32 4294901760, %v125_v61  ;;  %v137_v31 = vsub.f32 %v1289_v52, %v1322_v62  ;;  %v1367_v32 = vand.u32 4294901760, %v1327_v0 }
  0x12   :  { %103 = vmatpush.msra.mxu1 %v1281_v49  ;;  %54 = vmatpush.msra.mxu0 %v1208_v25  ;;  %v1370_v36 = vsub.f32 %v23_v55, %v1324_v63  ;;  %v1373_v39 = vand.u32 4294901760, %v1335_v6  ;;  %v1379_v42 = vand.u32 4294901760, %v131_v8  ;;  %v143_v44 = vsub.f32 %v1308_v58, %v1349_v12 }
  0x13   :  { %201 = vmatpush.msra.mxu2 %v1220_v29  ;;  %250 = vmatpush.msra.mxu3 %v1208_v25  ;;  %1640 = vst [vmem:[#allocation9_spill] sm:$0xff] %v1362_v30  ;;  %v1384_v47 = vsub.f32 %v22_v60, %v1351_v13  ;;  %v72_v48 = vsub.f32 %v1342_v7, %v1354_v18  ;;  %v1392_v53 = vand.u32 4294901760, %v137_v31  ;;  %vm385_vm0 = vcmask 1043456  }
  0x14   :  { %109 = vmatpush.msra.mxu1 %v1302_v56  ;;  %56 = vmatpush.msra.mxu0 %v1217_v28  ;;  %1641 = vst [vmem:[#allocation10_spill] sm:$0xff] %v1379_v42  ;;  %v149_v55 = vsub.f32 %v1327_v0, %v1367_v32  ;;  %v1397_v61 = vand.u32 4294901760, %v1370_v36  ;;  %v1400_v60 = vsub.f32 %v21_v1, %v1356_v26  ;;  %v1406_v8 = vand.u32 4294901760, %v143_v44 }
  0x15   :  { %204 = vmatpush.msra.mxu2 %v1251_v40  ;;  %252 = vmatpush.msra.mxu3 %v1217_v28  ;;  %1642 = vst [vmem:[#allocation11_spill] sm:$0xff] %v1392_v53  ;;  %v155_v31 = vsub.f32 %v1335_v6, %v1373_v39  ;;  %v1411_v7 = vand.u32 4294901760, %v1384_v47  ;;  %vm381_vm1 = vcmask 31744  }
  0x16   :  { %115 = vmatpush.msra.mxu1 %v1310_v59  ;;  %58 = vmatpush.msra.mxu0 %v1237_v35  ;;  %1643 = vst [vmem:[#allocation12_spill] sm:$0xff] %v1406_v8  ;;  %v1417_v1 = vand.u32 4294901760, %v149_v55  ;;  %v161_v44 = vsub.f32 %v1370_v36, %v1397_v61 }
  0x17   :  { %207 = vmatpush.msra.mxu2 %v1270_v46  ;;  %254 = vmatpush.msra.mxu3 %v1237_v35  ;;  %v167_v55 = vsub.f32 %v1384_v47, %v1411_v7 }
  0x18   :  { %121 = vmatpush.msra.mxu1 %v1332_v2  ;;  %60 = vmatpush.msra.mxu0 %v1267_v45  ;;  %v1428_v2 = vand.u32 4294901760, %v155_v31  ;;  %v1436_v59 = vand.u32 4294901760, %v161_v44 }
  0x19   :  { %210 = vmatpush.msra.mxu2 %v1289_v52  ;;  %256 = vmatpush.msra.mxu3 %v1267_v45  ;;  %v1443_v31 = vand.u32 4294901760, %v167_v55 }
  0x1a   :  { %127 = vmatpush.msra.mxu1 %v1362_v30  ;;  %62 = vmatpush.msra.mxu0 %v1286_v51  ;;  %v73_v30 = vand.u32 4294901760, %v72_v48 }
  0x1b   :  { %213 = vmatpush.msra.mxu2 %v1308_v58  ;;  %258 = vmatpush.msra.mxu3 %v1286_v51 }
  0x1c   :  { %133 = vmatpush.msra.mxu1 %v1379_v42  ;;  %64 = vmatpush.msra.mxu0 %v1293_v54  ;;  %v1422_v42 = vand.u32 4294901760, %v1400_v60 }
  0x1d   :  { %216 = vmatpush.msra.mxu2 %v1327_v0  ;;  %260 = vmatpush.msra.mxu3 %v1293_v54 }
  0x1e   :  { %139 = vmatpush.msra.mxu1 %v1392_v53  ;;  %66 = vmatpush.msra.mxu0 %v1324_v63  ;;  %v74_v53 = vsub.f32 %v72_v48, %v73_v30 }
  0x1f   :  { %219 = vmatpush.msra.mxu2 %v1335_v6  ;;  %262 = vmatpush.msra.mxu3 %v1324_v63 }
  0x20   :  { %145 = vmatpush.msra.mxu1 %v1406_v8  ;;  %68 = vmatpush.msra.mxu0 %v1351_v13  ;;  %v173_v8 = vsub.f32 %v1400_v60, %v1422_v42  ;;  %v75_v56 = vand.u32 4294901760, %v74_v53 }
  0x21   :  { %222 = vmatpush.msra.mxu2 %v1370_v36  ;;  %264 = vmatpush.msra.mxu3 %v1351_v13 }
  0x22   :  { %151 = vmatpush.msra.mxu1 %v1417_v1  ;;  %70 = vmatpush.msra.mxu0 %v1356_v26  ;;  %v1449_v44 = vand.u32 4294901760, %v173_v8 }
  0x23   :  { %225 = vmatpush.msra.mxu2 %v1384_v47  ;;  %266 = vmatpush.msra.mxu3 %v1356_v26 }
  0x24   :  { %277 = vmatpush.msrb.mxu0 %v1200_v22  ;;  %157 = vmatpush.msra.mxu1 %v1428_v2 }
  0x25   :  { %228 = vmatpush.msra.mxu2 %v1400_v60  ;;  %270 = vmatmul.f32.vlgmr.msra.gmra.mxu3 %v73_v30 }
  0x26   :  { %281 = vmatpush.msrb.mxu0 %v1203_v23  ;;  %163 = vmatpush.msra.mxu1 %v1436_v59 }
  0x27   :  { %231 = vmatmul.f32.vlgmr.msra.gmra.mxu2 %v72_v48  ;;  %76 = vmatmul.f32.vlgmr.msra.gmra.mxu0 %v75_v56 }
  0x28   :  { %285 = vmatpush.msrb.mxu0 %v1206_v24  ;;  %169 = vmatpush.msra.mxu1 %v1443_v31 }
  0x2a   :  { %289 = vmatpush.msrb.mxu0 %v1215_v27  ;;  %175 = vmatpush.msra.mxu1 %v1449_v44 }
  0x2b   :  { %177 = vmatmul.f32.vlgmr.msra.gmra.mxu1 %v1354_v18 }
  0x2c   :  { %344 = vmatpush.msrb.mxu1 %v1146_v3  ;;  %293 = vmatpush.msrb.mxu0 %v1231_v33 }
  0x2e   :  { %346 = vmatpush.msrb.mxu1 %v1148_v4  ;;  %297 = vmatpush.msrb.mxu0 %v1235_v34 }
  0x30   :  { %348 = vmatpush.msrb.mxu1 %v1150_v5  ;;  %301 = vmatpush.msrb.mxu0 %v1255_v41 }
  0x32   :  { %350 = vmatpush.msrb.mxu1 %v1161_v9  ;;  %305 = vmatpush.msrb.mxu0 %v1284_v50 }
  0x34   :  { %352 = vmatpush.msrb.mxu1 %v1163_v10  ;;  %309 = vmatpush.msrb.mxu0 %v1305_v57 }
  0x36   :  { %354 = vmatpush.msrb.mxu1 %v1165_v11  ;;  %313 = vmatpush.msrb.mxu0 %v1322_v62 }
  0x38   :  { %356 = vmatpush.msrb.mxu1 %v1183_v17  ;;  %317 = vmatpush.msrb.mxu0 %v1349_v12 }
  0x3a   :  { %358 = vmatpush.msrb.mxu1 %v1208_v25  ;;  %321 = vmatpush.msrb.mxu0 %v1367_v32 }
  0x3c   :  { %360 = vmatpush.msrb.mxu1 %v1217_v28  ;;  %325 = vmatpush.msrb.mxu0 %v1373_v39 }
  0x3e   :  { %362 = vmatpush.msrb.mxu1 %v1237_v35  ;;  %329 = vmatpush.msrb.mxu0 %v1397_v61 }
  0x40   :  { %364 = vmatpush.msrb.mxu1 %v1267_v45  ;;  %333 = vmatpush.msrb.mxu0 %v1411_v7 }
  0x42   :  { %366 = vmatpush.msrb.mxu1 %v1286_v51  ;;  %337 = vmatpush.msrb.mxu0 %v1422_v42 }
  0x43   :  { %339 = vmatmul.f32.vlgmr.msrb.gmra.mxu0 %v1354_v18 }
  0x44   :  { %368 = vmatpush.msrb.mxu1 %v1293_v54  ;;  %681 = vmatpush.msra.mxu0 %v1175_v14  ;;  %v37_v14 = vld [vmem:[%s1626_s4] sm:$0xf] }
  0x46   :  { %370 = vmatpush.msrb.mxu1 %v1324_v63  ;;  %684 = vmatpush.msra.mxu0 %v1178_v15  ;;  %v387_v15 = vsel %vm385_vm0, %v37_v14, 0 }
  0x48   :  { %372 = vmatpush.msrb.mxu1 %v1351_v13  ;;  %687 = vmatpush.msra.mxu0 %v1181_v16  ;;  %v1521_v16 = vand.u32 4294901760, %v387_v15 }
  0x4a   :  { %374 = vmatpush.msrb.mxu1 %v1356_v26  ;;  %690 = vmatpush.msra.mxu0 %v1190_v19  ;;  %v1524_v19 = vsub.f32 %v387_v15, %v1521_v16 }
  0x4b   :  { %376 = vmatmul.f32.vlgmr.msrb.gmra.mxu1 %v1354_v18  ;;  %405 = vmatpush.msrb.mxu2 %v1521_v16 }
  0x4c   :  { %734 = vmatpush.msra.mxu1 %v1146_v3  ;;  %693 = vmatpush.msra.mxu0 %v1193_v20  ;;  %v1529_v20 = vand.u32 4294901760, %v1524_v19 }
  0x4d   :  { %458 = vmatpush.msra.mxu2 %v1524_v19 }
  0x4e   :  { %736 = vmatpush.msra.mxu1 %v1148_v4  ;;  %696 = vmatpush.msra.mxu0 %v1196_v21  ;;  %v433_v21 = vsub.f32 %v1524_v19, %v1529_v20 }
  0x50   :  { %738 = vmatpush.msra.mxu1 %v1150_v5  ;;  %699 = vmatpush.msra.mxu0 %v1220_v29  ;;  %v434_v29 = vand.u32 4294901760, %v433_v21  ;;  %v1644_v21 = vld [vmem:[#allocation5_spill] sm:$0xff] }
  0x52   :  { %740 = vmatpush.msra.mxu1 %v1161_v9  ;;  %702 = vmatpush.msra.mxu0 %v1251_v40 }
  0x53   :  { %435 = vmatpush.msrb.mxu3 %v434_v29 }
  0x54   :  { %742 = vmatpush.msra.mxu1 %v1163_v10  ;;  %705 = vmatpush.msra.mxu0 %v1270_v46 }
  0x55   :  { %481 = vmatpush.msra.mxu3 %v1521_v16 }
  0x56   :  { %744 = vmatpush.msra.mxu1 %v1165_v11  ;;  %708 = vmatpush.msra.mxu0 %v1289_v52 }
  0x58   :  { %746 = vmatpush.msra.mxu1 %v1183_v17  ;;  %711 = vmatpush.msra.mxu0 %v1308_v58 }
  0x5a   :  { %748 = vmatpush.msra.mxu1 %v1208_v25  ;;  %714 = vmatpush.msra.mxu0 %v1327_v0 }
  0x5c   :  { %750 = vmatpush.msra.mxu1 %v1217_v28  ;;  %717 = vmatpush.msra.mxu0 %v1335_v6 }
  0x5e   :  { %752 = vmatpush.msra.mxu1 %v1237_v35  ;;  %720 = vmatpush.msra.mxu0 %v1370_v36 }
  0x60   :  { %754 = vmatpush.msra.mxu1 %v1267_v45  ;;  %723 = vmatpush.msra.mxu0 %v1384_v47 }
  0x62   :  { %756 = vmatpush.msra.mxu1 %v1286_v51  ;;  %726 = vmatpush.msra.mxu0 %v1400_v60 }
  0x64   :  { %758 = vmatpush.msra.mxu1 %v1293_v54  ;;  %915 = vmatpush.msrb.mxu0 %v1521_v16 }
  0x66   :  { %760 = vmatpush.msra.mxu1 %v1324_v63 }
  0x68   :  { %762 = vmatpush.msra.mxu1 %v1351_v13 }
  0x6a   :  { %764 = vmatpush.msra.mxu1 %v1356_v26 }
  0x6c   :  { %945 = vmatpush.msrb.mxu1 %v434_v29  ;;  %v1645_v29 = vld [vmem:[#allocation6_spill] sm:$0xff] }
  0xa4   :  { %v77_v46 = vpop.f32.mrf.mxu0 }
  0xa8   :  { %v178_v40 = vpop.f32.mrf.mxu1  ;;  %v271_v0 = vpop.f32.mrf.mxu3 }
  0xa9   :  { %v179_v52 = vadd.f32 %v178_v40, %v77_v46  ;;  %v1646_v40 = vld [vmem:[#allocation7_spill] sm:$0xff] }
  0xaa   :  { %v232_v56 = vpop.f32.mrf.mxu2 }
  0xab   :  { %v233_v58 = vadd.f32 %v232_v56, %v179_v52 }
  0xad   :  { %v272_v6 = vadd.f32 %v271_v0, %v233_v58 }
  0xc0   :  { %v340_v18 = vpop.f32.mrf.mxu0 }
  0xc1   :  { %v341_v30 = vadd.f32 %v340_v18, %v272_v6 }
  0xc8   :  { %v377_v36 = vpop.f32.mrf.mxu1 }
  0xc9   :  { %v378_v47 = vadd.f32 %v377_v36, %v341_v30 }
  0xcb   :  { %v380_v48 = vmul.f32 0.03125, %v378_v47 }
  0xcd   :  { %v383_v53 = vsel %vm381_vm1, %v380_v48, 0 }
  0xce   :  { %v406_v60 = vand.u32 4294901760, %v383_v53 }
  0xd0   :  { %v407_v8 = vsub.f32 %v383_v53, %v406_v60  ;;  %437 = vmatmul.f32.vlgmr.msrb.gmra.mxu3 %v406_v60 }
  0xd1   :  { %529 = vmatpush.msrb.mxu3 %v1521_v16 }
  0xd2   :  { %v408_v55 = vand.u32 4294901760, %v407_v8 }
  0xd4   :  { %v409_v14 = vsub.f32 %v407_v8, %v408_v55 }
  0xd6   :  { %v410_v15 = vand.u32 4294901760, %v409_v14 }
  0xd8   :  { %411 = vmatmul.f32.vlgmr.msrb.gmra.mxu2 %v410_v15  ;;  %485 = vmatmul.f32.vlgmr.msra.gmra.mxu3 %v408_v55 }
  0xd9   :  { %507 = vmatpush.msrb.mxu2 %v1529_v20  ;;  %583 = vmatpush.msra.mxu3 %v1243_v37  ;;  %v1647_v37 = vld [vmem:[#allocation9_spill] sm:$0xff] }
  0xdb   :  { %589 = vmatpush.msra.mxu3 %v1246_v38  ;;  %v1648_v38 = vld [vmem:[#allocation10_spill] sm:$0xff] }
  0xdd   :  { %595 = vmatpush.msra.mxu3 %v1263_v43  ;;  %v1649_v43 = vld [vmem:[#allocation11_spill] sm:$0xff] }
  0xdf   :  { %601 = vmatpush.msra.mxu3 %v1281_v49  ;;  %v1650_v49 = vld [vmem:[#allocation12_spill] sm:$0xff] }
  0xe0   :  { %461 = vmatmul.f32.vlgmr.msra.gmra.mxu2 %v407_v8  ;;  %531 = vmatmul.f32.vlgmr.msrb.gmra.mxu3 %v406_v60 }
  0xe1   :  { %538 = vmatpush.msra.mxu2 %v1146_v3  ;;  %607 = vmatpush.msra.mxu3 %v1644_v21 }
  0xe3   :  { %540 = vmatpush.msra.mxu2 %v1148_v4  ;;  %613 = vmatpush.msra.mxu3 %v1645_v29 }
  0xe5   :  { %542 = vmatpush.msra.mxu2 %v1150_v5  ;;  %619 = vmatpush.msra.mxu3 %v1646_v40 }
  0xe7   :  { %544 = vmatpush.msra.mxu2 %v1161_v9  ;;  %625 = vmatpush.msra.mxu3 %v1647_v37 }
  0xe8   :  { %509 = vmatmul.f32.vlgmr.msrb.gmra.mxu2 %v406_v60 }
  0xe9   :  { %546 = vmatpush.msra.mxu2 %v1163_v10  ;;  %631 = vmatpush.msra.mxu3 %v1648_v38 }
  0xeb   :  { %548 = vmatpush.msra.mxu2 %v1165_v11  ;;  %637 = vmatpush.msra.mxu3 %v1649_v43 }
  0xed   :  { %550 = vmatpush.msra.mxu2 %v1183_v17  ;;  %643 = vmatpush.msra.mxu3 %v1650_v49 }
  0xef   :  { %552 = vmatpush.msra.mxu2 %v1208_v25  ;;  %649 = vmatpush.msra.mxu3 %v1417_v1 }
  0xf1   :  { %554 = vmatpush.msra.mxu2 %v1217_v28  ;;  %655 = vmatpush.msra.mxu3 %v1428_v2 }
  0xf3   :  { %556 = vmatpush.msra.mxu2 %v1237_v35  ;;  %661 = vmatpush.msra.mxu3 %v1436_v59 }
  0xf5   :  { %558 = vmatpush.msra.mxu2 %v1267_v45  ;;  %667 = vmatpush.msra.mxu3 %v1443_v31 }
  0xf7   :  { %560 = vmatpush.msra.mxu2 %v1286_v51  ;;  %673 = vmatpush.msra.mxu3 %v1449_v44 }
  0xf9   :  { %842 = vmatpush.msrb.mxu3 %v1146_v3  ;;  %562 = vmatpush.msra.mxu2 %v1293_v54 }
  0xfb   :  { %844 = vmatpush.msrb.mxu3 %v1148_v4  ;;  %564 = vmatpush.msra.mxu2 %v1324_v63 }
  0xfd   :  { %846 = vmatpush.msrb.mxu3 %v1150_v5  ;;  %566 = vmatpush.msra.mxu2 %v1351_v13 }
  0xff   :  { %848 = vmatpush.msrb.mxu3 %v1161_v9  ;;  %568 = vmatpush.msra.mxu2 %v1356_v26 }
 0x101   :  { %775 = vmatpush.msrb.mxu2 %v1200_v22  ;;  %850 = vmatpush.msrb.mxu3 %v1163_v10 }
 0x103   :  { %779 = vmatpush.msrb.mxu2 %v1203_v23  ;;  %852 = vmatpush.msrb.mxu3 %v1165_v11 }
 0x105   :  { %783 = vmatpush.msrb.mxu2 %v1206_v24  ;;  %854 = vmatpush.msrb.mxu3 %v1183_v17 }
 0x107   :  { %787 = vmatpush.msrb.mxu2 %v1215_v27  ;;  %856 = vmatpush.msrb.mxu3 %v1208_v25  ;;  %v1651_v27 = vld [vmem:[#allocation8_spill] sm:$0xff] }
 0x109   :  { %791 = vmatpush.msrb.mxu2 %v1231_v33  ;;  %858 = vmatpush.msrb.mxu3 %v1217_v28 }
 0x10b   :  { %795 = vmatpush.msrb.mxu2 %v1235_v34  ;;  %860 = vmatpush.msrb.mxu3 %v1237_v35 }
 0x10d   :  { %799 = vmatpush.msrb.mxu2 %v1255_v41  ;;  %862 = vmatpush.msrb.mxu3 %v1267_v45 }
 0x10f   :  { %803 = vmatpush.msrb.mxu2 %v1284_v50  ;;  %864 = vmatpush.msrb.mxu3 %v1286_v51 }
 0x111   :  { %807 = vmatpush.msrb.mxu2 %v1305_v57  ;;  %866 = vmatpush.msrb.mxu3 %v1293_v54 }
 0x113   :  { %811 = vmatpush.msrb.mxu2 %v1322_v62  ;;  %868 = vmatpush.msrb.mxu3 %v1324_v63 }
 0x115   :  { %815 = vmatpush.msrb.mxu2 %v1349_v12  ;;  %870 = vmatpush.msrb.mxu3 %v1351_v13 }
 0x117   :  { %819 = vmatpush.msrb.mxu2 %v1367_v32  ;;  %872 = vmatpush.msrb.mxu3 %v1356_v26 }
 0x119   :  { %823 = vmatpush.msrb.mxu2 %v1373_v39 }
 0x11b   :  { %827 = vmatpush.msrb.mxu2 %v1397_v61 }
 0x11d   :  { %831 = vmatpush.msrb.mxu2 %v1411_v7 }
 0x11f   :  { %835 = vmatpush.msrb.mxu2 %v1422_v42 }
 0x153   :  { %v438_v3 = vpop.f32.mrf.mxu3 }
 0x15b   :  { %v412_v4 = vpop.f32.mrf.mxu2  ;;  %v486_v5 = vpop.f32.mrf.mxu3 }
 0x15c   :  { %v439_v10 = vadd.f32 %v438_v3, %v412_v4 }
 0x163   :  { %v462_v9 = vpop.f32.mrf.mxu2  ;;  %v532_v24 = vpop.f32.mrf.mxu3 }
 0x164   :  { %v463_v11 = vadd.f32 %v462_v9, %v439_v10 }
 0x166   :  { %v487_v17 = vadd.f32 %v486_v5, %v463_v11 }
 0x16b   :  { %v510_v22 = vpop.f32.mrf.mxu2 }
 0x16c   :  { %v511_v23 = vadd.f32 %v510_v22, %v487_v17 }
 0x16e   :  { %v533_v25 = vadd.f32 %v532_v24, %v511_v23 }
 0x170   :  { %v1603_v28 = vsub.f32 %v1651_v27, %v533_v25 }
 0x172   :  { %v536_v33 = vmul.f32 %v1603_v28, %v1603_v28 }
 0x174   :  { %v569_v34 = vand.u32 4294901760, %v536_v33 }
 0x176   :  { %675 = vmatmul.f32.vlgmr.msra.gmra.mxu3 %v569_v34  ;;  %v570_v35 = vsub.f32 %v536_v33, %v569_v34 }
 0x178   :  { %729 = vmatmul.f32.vlgmr.msra.gmra.mxu0 %v570_v35  ;;  %v571_v41 = vand.u32 4294901760, %v570_v35 }
 0x179   :  { %968 = vmatpush.msra.mxu0 %v1524_v19 }
 0x17a   :  { %768 = vmatmul.f32.vlgmr.msra.gmra.mxu1 %v571_v41  ;;  %v572_v45 = vsub.f32 %v570_v35, %v571_v41 }
 0x17b   :  { %991 = vmatpush.msra.mxu1 %v1521_v16 }
 0x17c   :  { %v573_v50 = vand.u32 4294901760, %v572_v45 }
 0x17e   :  { %574 = vmatmul.f32.vlgmr.msra.gmra.mxu2 %v573_v50  ;;  %874 = vmatmul.f32.vlgmr.msrb.gmra.mxu3 %v569_v34 }
 0x186   :  { %837 = vmatmul.f32.vlgmr.msrb.gmra.mxu2 %v569_v34 }
 0x1f5   :  { %v730_v59 = vpop.f32.mrf.mxu0 }
 0x1f7   :  { %v769_v63 = vpop.f32.mrf.mxu1 }
 0x1f9   :  { %v676_v51 = vpop.f32.mrf.mxu3 }
 0x201   :  { %v575_v54 = vpop.f32.mrf.mxu2  ;;  %v875_v13 = vpop.f32.mrf.mxu3 }
 0x202   :  { %v677_v57 = vadd.f32 %v676_v51, %v575_v54 }
 0x204   :  { %v731_v62 = vadd.f32 %v730_v59, %v677_v57 }
 0x206   :  { %v770_v2 = vadd.f32 %v769_v63, %v731_v62 }
 0x209   :  { %v838_v7 = vpop.f32.mrf.mxu2 }
 0x20a   :  { %v839_v12 = vadd.f32 %v838_v7, %v770_v2 }
 0x20c   :  { %v876_v26 = vadd.f32 %v875_v13, %v839_v12 }
 0x20e   :  { %v878_v32 = vmul.f32 0.032258064, %v876_v26 }
 0x210   :  { %1076 = vrsqrt.f32 %v878_v32  ;;  %vm886_vm2 = vcmp.eq.f32.partialorder %v878_v32, inf  ;;  %v889_v46 = vand.u32 2147483648, %v878_v32  ;;  %vm888_vm3 = vcmp.eq.f32.partialorder %v878_v32, 0.0 }
 0x216   :  { %v1077_v39 = vpop.eup %1076 }
 0x217   :  { %v880_v42 = vmul.f32 %v1077_v39, %v878_v32 }
 0x219   :  { %v881_v61 = vmul.f32 %v1077_v39, %v880_v42 }
 0x21b   :  { %v882_v1 = vmul.f32 0.5, %v881_v61 }
 0x21d   :  { %v883_v31 = vsub.f32 1.5, %v882_v1 }
 0x21f   :  { %v884_v44 = vmul.f32 %v1077_v39, %v883_v31 }
 0x221   :  { %v885_v19 = vmul.f32 %v884_v44, %v878_v32 }
 0x223   :  { %v887_v52 = vsel %vm886_vm2, %v878_v32, %v885_v19 }
 0x224   :  { %v890_v56 = vsel %vm888_vm3, %v889_v46, %v887_v52 }
 0x225   :  { %v891_v58 = vadd.f32 1e-06, %v890_v56 }
 0x227   :  { %1078 = vrcp.f32 %v891_v58 }
 0x22d   :  { %v1079_v0 = vpop.eup %1078 }
 0x22e   :  { %v893_v6 = vmul.f32 %v1079_v0, %v891_v58 }
 0x230   :  { %v894_v18 = vsub.f32 2.0, %v893_v6 }
 0x232   :  { %v895_v30 = vmul.f32 %v1079_v0, %v894_v18 }
 0x234   :  { %v897_v36 = vsel %vm381_vm1, %v895_v30, 0 }
 0x235   :  { %v916_v47 = vand.u32 4294901760, %v897_v36 }
 0x237   :  { %v917_v48 = vsub.f32 %v897_v36, %v916_v47  ;;  %947 = vmatmul.f32.vlgmr.msrb.gmra.mxu1 %v916_v47 }
 0x238   :  { %1039 = vmatpush.msrb.mxu1 %v1521_v16  ;;  %v1074_v16 = vld [vmem:[%s1623_s1] ss:$0 sm:$0xff] }
 0x239   :  { %v918_v53 = vand.u32 4294901760, %v917_v48 }
 0x23b   :  { %v919_v60 = vsub.f32 %v917_v48, %v918_v53 }
 0x23d   :  { %v920_v8 = vand.u32 4294901760, %v919_v60 }
 0x23f   :  { %921 = vmatmul.f32.vlgmr.msrb.gmra.mxu0 %v920_v8  ;;  %995 = vmatmul.f32.vlgmr.msra.gmra.mxu1 %v918_v53 }
 0x240   :  { %1017 = vmatpush.msrb.mxu0 %v1529_v20  ;;  %v1075_v20 = vld [vmem:[%s1624_s2] ss:$0 sm:$0xff] }
 0x247   :  { %971 = vmatmul.f32.vlgmr.msra.gmra.mxu0 %v917_v48  ;;  %1041 = vmatmul.f32.vlgmr.msrb.gmra.mxu1 %v916_v47 }
 0x24f   :  { %1019 = vmatmul.f32.vlgmr.msrb.gmra.mxu0 %v916_v47 }
 0x2b4   :  { %v948_v55 = vpop.f32.mrf.mxu1 }
 0x2bc   :  { %v922_v14 = vpop.f32.mrf.mxu0  ;;  %v996_v15 = vpop.f32.mrf.mxu1 }
 0x2bd   :  { %v949_v29 = vadd.f32 %v948_v55, %v922_v14 }
 0x2c4   :  { %v972_v21 = vpop.f32.mrf.mxu0  ;;  %v1042_v49 = vpop.f32.mrf.mxu1 }
 0x2c5   :  { %v973_v40 = vadd.f32 %v972_v21, %v949_v29 }
 0x2c7   :  { %v997_v37 = vadd.f32 %v996_v15, %v973_v40 }
 0x2cc   :  { %v1020_v38 = vpop.f32.mrf.mxu0 }
 0x2cd   :  { %v1021_v43 = vadd.f32 %v1020_v38, %v997_v37 }
 0x2cf   :  { %v1043_v3 = vadd.f32 %v1042_v49, %v1021_v43 }
 0x2d1   :  { %v1050_v4 = vmul.f32 %v1074_v16, %v1043_v3 }
 0x2d3   :  { %v1051_v5 = vmul.f32 %v1050_v4, %v1603_v28 }
 0x2d5   :  { %v1055_v9 = vadd.f32 %v1075_v20, %v1051_v5 }
 0x2d7   :  { %1056 = vst [vmem:[#allocation2] sm:$0xf] %v1055_v9 }
 0x2d8   :  { %1067 = dma.vmem_to_hbm [thread:$0]  %s1063_s6, 64, %s1065_s9, [#allocation3]  }
 0x2d9   :  { %1104 = dma.done.wait [#allocation3], 64  }
 0x2da   :  { %1105 = vsyncadd [#allocation3], 4294967232 }
 0x2db   :  { %1072 = vsyncpa [#allocation3], 1 }

</bundles_post_ra>
